<compile_context>
chip_gen: v5e
topology: v5e:2x2
jax: 0.10.0
libtpu: 0.0.40
codegen_flags: <defaults>
</compile_context>

<pallas_src>
import jax
import jax.numpy as jnp
from jax.experimental import pallas as pl
from jax.experimental.pallas import tpu as pltpu

EPS = 1e-6  # F.pairwise_distance default eps (added to the elementwise diff)

_LANE = 128
_SUBLANE = 8
_STREAM_BUDGET_BYTES = 24 * 1024 * 1024  # double-buffered streaming blocks
_VMEM_LIMIT_BYTES = 48 * 1024 * 1024     # > v5e/v6e scoped defaults, < v7x 64 MiB


def _fold_params(d):
    """Return (d_pad, k): pad feature dim to d_pad, fold k samples per lane-row."""
    if d <= _LANE:
        d_pad = 1
        while d_pad < d:
            d_pad *= 2               # next power of two (divides 128)
        k = _LANE // d_pad
    else:
        d_pad = pl.cdiv(d, _LANE) * _LANE
        k = 1
    return d_pad, k


def _make_kernel(batch, tile_rows, k, needs_mask, pad_corr, use_matmul):
    def kernel(margin_ref, x1_ref, x2_ref, lab_ref, *rest):
        # margin_ref: SMEM (1,) f32
        # x1_ref/x2_ref: VMEM (T, CW) native dtype (lane-dense folded features)
        # lab_ref: VMEM (T, k) f32
        # rest: [seg_ref (CW, k) f32 if use_matmul], out_ref (1, 8, 128) f32
        if use_matmul:
            seg_ref, out_ref = rest
        else:
            (out_ref,) = rest

        # Upcast in-kernel (VPU has slack; halves HBM bytes for bf16 inputs).
        x1 = x1_ref[...].astype(jnp.float32)
        x2 = x2_ref[...].astype(jnp.float32)
        diff = (x1 - x2) + jnp.float32(EPS)          # (T, CW)
        sq = diff * diff                             # (T, CW)

        if use_matmul:
            # Segment sum over each sample's D_pad lanes via the (idle) MXU.
            # HIGHEST precision keeps f32 accuracy (no bf16 truncation of sq).
            dist_sq = jnp.dot(sq, seg_ref[...],
                              precision=jax.lax.Precision.HIGHEST,
                              preferred_element_type=jnp.float32)  # (T, k)
        else:
            dist_sq = jnp.sum(sq, axis=-1, keepdims=True)          # (T, 1)

        if pad_corr != 0.0:
            # Zero-padded feature lanes contribute exactly eps^2 each; remove.
            dist_sq = jnp.maximum(dist_sq - jnp.float32(pad_corr), 0.0)

        dist = jnp.sqrt(dist_sq)                     # EUP, lane-dense-ish (T, k)
        lab = lab_ref[...]                           # (T, k) f32
        margin = margin_ref[0]                       # SMEM scalar
        hinge = jnp.maximum(margin - dist, 0.0)
        per_sample = (1.0 - lab) * dist_sq + lab * (hinge * hinge)

        if needs_mask:
            # Drop batch-padding rows and ragged-tile garbage with a SELECT
            # (never arithmetic masking: garbage may be NaN/Inf).
            i = pl.program_id(0)
            r = jax.lax.broadcasted_iota(jnp.int32, per_sample.shape, 0)
            c = jax.lax.broadcasted_iota(jnp.int32, per_sample.shape, 1)
            sample = (i * tile_rows + r) * k + c
            per_sample = jnp.where(sample < batch, per_sample, 0.0)

        # Per-tile partial sum -> own lane-dense output block (no cross-step
        # accumulator), so the grid axis can be "parallel" (both TCs on v7x).
        partial = jnp.sum(per_sample)
        out_ref[...] = jnp.full(out_ref.shape, partial, dtype=jnp.float32)

    return kernel


def contrastive_loss(output1, output2, label, margin=1.0, tile_rows=None):
    """Mean of (1-y)*d^2 + y*clamp(margin-d, 0)^2 with d = ||x1-x2+eps||_2."""
    B, D = output1.shape
    assert output2.shape == (B, D)

    d_pad, k = _fold_params(D)
    cw = k * d_pad  # folded row width; multiple of 128

    x1 = output1
    x2 = output2
    lab = jnp.asarray(label, jnp.float32).reshape(B)

    # Feature-dim zero pad (copy only when D is not a divisor/multiple of 128).
    if d_pad != D:
        x1 = jnp.pad(x1, [(0, 0), (0, d_pad - D)])
        x2 = jnp.pad(x2, [(0, 0), (0, d_pad - D)])

    # Batch pad so the fold reshape is legal (copy only if k does not divide B).
    b_pad = pl.cdiv(B, k) * k
    if b_pad != B:
        x1 = jnp.pad(x1, [(0, b_pad - B), (0, 0)])
        x2 = jnp.pad(x2, [(0, b_pad - B), (0, 0)])
        lab = jnp.pad(lab, [(0, b_pad - B)])

    rows = b_pad // k
    x1f = x1.reshape(rows, cw)       # contiguous reshape: free
    x2f = x2.reshape(rows, cw)
    labf = lab.reshape(rows, k)

    # --- Tile sizing from the PADDED VMEM footprint -------------------------
    itemsize = jnp.dtype(output1.dtype).itemsize
    # per row, per pipeline buffer: 2 lane-dense feature rows + label row
    # padded to 128 lanes of f32 (= 512 B).
    bytes_per_row = 2 * cw * itemsize + _LANE * 4
    # resident segment-sum matrix (double-buffered, lane-padded) + outputs.
    fixed = 2 * (cw * _LANE * 4) + 2 * (_SUBLANE * _LANE * 4)
    budget = max(_STREAM_BUDGET_BYTES - fixed, 1 << 20)
    if tile_rows is None:
        t = budget // (2 * bytes_per_row)            # 2 pipeline buffers
        t = max(16, (t // 16) * 16)                  # bf16 sublane packing
    else:
        t = max(_SUBLANE, (int(tile_rows) // _SUBLANE) * _SUBLANE)
    if t >= rows:
        t = rows                                     # full-extent block is legal
    num_tiles = pl.cdiv(rows, t)
    needs_mask = (b_pad != B) or (rows % t != 0)
    pad_corr = float(d_pad - D) * EPS * EPS
    use_matmul = k > 1

    margin_arr = jnp.asarray([margin], jnp.float32)
    kernel = _make_kernel(B, t, k, needs_mask, pad_corr, use_matmul)

    in_specs = [
        pl.BlockSpec(memory_space=pltpu.MemorySpace.SMEM),     # margin (1,)
        pl.BlockSpec((t, cw), lambda i: (i, 0)),               # folded output1
        pl.BlockSpec((t, cw), lambda i: (i, 0)),               # folded output2
        pl.BlockSpec((t, k), lambda i: (i, 0)),                # folded label
    ]
    args = [margin_arr, x1f, x2f, labf]
    if use_matmul:
        seg = (jnp.arange(cw, dtype=jnp.int32)[:, None] // d_pad
               == jnp.arange(k, dtype=jnp.int32)[None, :]).astype(jnp.float32)
        in_specs.append(pl.BlockSpec((cw, k), lambda i: (0, 0)))  # resident S
        args.append(seg)

    out = pl.pallas_call(
        kernel,
        out_shape=jax.ShapeDtypeStruct((num_tiles, _SUBLANE, _LANE), jnp.float32),
        grid=(num_tiles,),
        in_specs=in_specs,
        out_specs=pl.BlockSpec((1, _SUBLANE, _LANE), lambda i: (i, 0, 0)),
        compiler_params=pltpu.CompilerParams(
            dimension_semantics=("parallel",),
            vmem_limit_bytes=_VMEM_LIMIT_BYTES),
    )(*args)

    # Tiny final reduction + mean over the TRUE batch size.
    return jnp.sum(out[:, 0, 0]) * jnp.float32(1.0 / B)


def contrastive_loss_ref(output1, output2, label, margin=1.0):
    # Pure-JAX reference matching torch semantics (computed in f32).
    x1 = output1.astype(jnp.float32)
    x2 = output2.astype(jnp.float32)
    lab = jnp.asarray(label, jnp.float32).reshape(-1)
    d = jnp.sqrt(jnp.sum((x1 - x2 + EPS) ** 2, axis=-1))
    return jnp.mean((1.0 - lab) * d**2
                    + lab * jnp.clip(margin - d, 0.0) ** 2)


if __name__ == "__main__":
    root = jax.random.PRNGKey(0)
    keys = jax.random.split(root, 12)

    # Test 1: single-tile fast path, f32, D=32 (k=4), margin=1.0.
    B, D = 8, 32
    o1 = jax.random.normal(keys[0], (B, D), dtype=jnp.float32)
    o2 = jax.random.normal(keys[1], (B, D), dtype=jnp.float32)
    lab = jax.random.bernoulli(keys[2], 0.5, (B,)).astype(jnp.float32)
    got = jax.block_until_ready(contrastive_loss(o1, o2, lab))
    want = contrastive_loss_ref(o1, o2, lab)
    assert jnp.allclose(got, want, rtol=1e-5, atol=1e-5), (got, want)

    # Test 2: multi-tile "parallel" grid with batch padding + ragged tail
    # (B=83 -> b_pad=84, rows=21, tile=8 -> 3 tiles) and non-default margin.
    B2, D2 = 83, 32
    o1b = jax.random.normal(keys[3], (B2, D2), dtype=jnp.float32)
    o2b = jax.random.normal(keys[4], (B2, D2), dtype=jnp.float32)
    labb = jax.random.bernoulli(keys[5], 0.5, (B2,)).astype(jnp.float32)
    got2 = jax.block_until_ready(
        contrastive_loss(o1b, o2b, labb, margin=2.0, tile_rows=8))
    want2 = contrastive_loss_ref(o1b, o2b, labb, margin=2.0)
    assert jnp.allclose(got2, want2, rtol=1e-5, atol=1e-5), (got2, want2)

    # Test 3: native bf16 inputs streamed without wrapper-side f32 casts, D=64.
    B3, D3 = 64, 64
    o1c = jax.random.normal(keys[6], (B3, D3), dtype=jnp.float32).astype(jnp.bfloat16)
    o2c = jax.random.normal(keys[7], (B3, D3), dtype=jnp.float32).astype(jnp.bfloat16)
    labc = jax.random.bernoulli(keys[8], 0.5, (B3,)).astype(jnp.float32)
    got3 = jax.block_until_ready(contrastive_loss(o1c, o2c, labc))
    want3 = contrastive_loss_ref(o1c, o2c, labc)
    assert jnp.allclose(got3, want3, rtol=1e-5, atol=1e-5), (got3, want3)

    # Test 4: awkward D=48 (padded to 64, eps correction path), k=2.
    B4, D4 = 16, 48
    o1d = jax.random.normal(keys[9], (B4, D4), dtype=jnp.float32)
    o2d = jax.random.normal(keys[10], (B4, D4), dtype=jnp.float32)
    labd = jax.random.bernoulli(keys[11], 0.5, (B4,)).astype(jnp.float32)
    got4 = jax.block_until_ready(contrastive_loss(o1d, o2d, labd))
    want4 = contrastive_loss_ref(o1d, o2d, labd)
    assert jnp.allclose(got4, want4, rtol=1e-5, atol=1e-5), (got4, want4)

    print("KERNEL_OK")
</pallas_src>

<mosaic_0001>
module attributes {stable_mosaic.version = 11 : i64} {
  func.func @kernel(%arg0: i32, %arg1: memref<1xf32, #tpu.memory_space<smem>>, %arg2: memref<2x128xf32, #tpu.memory_space<vmem>>, %arg3: memref<2x128xf32, #tpu.memory_space<vmem>>, %arg4: memref<2x4xf32, #tpu.memory_space<vmem>>, %arg5: memref<128x4xf32, #tpu.memory_space<vmem>>, %arg6: memref<1x8x128xf32, #tpu.memory_space<vmem>>) attributes {dimension_semantics = [#tpu.dimension_semantics<parallel>], iteration_bounds = array<i64: 1>, scalar_prefetch = 0 : i64, scratch_operands = 0 : i64, tpu.core_type = #tpu.core_type<tc>, window_params = [{transform_indices = @transform_0, window_bounds = array<i64: 1>}, {transform_indices = @transform_1, window_bounds = array<i64: 2, 128>}, {transform_indices = @transform_2, window_bounds = array<i64: 2, 128>}, {transform_indices = @transform_3, window_bounds = array<i64: 2, 4>}, {pipeline_mode = #tpu.pipeline_mode<synchronous>, transform_indices = @transform_4, window_bounds = array<i64: 128, 4>}, {transform_indices = @transform_5, window_bounds = array<i64: 1, 8, 128>}]} {
    %c0 = arith.constant 0 : index
    %c0_0 = arith.constant 0 : index
    %0 = vector.load %arg2[%c0, %c0_0] : memref<2x128xf32, #tpu.memory_space<vmem>>, vector<2x128xf32>
    %c0_1 = arith.constant 0 : index
    %c0_2 = arith.constant 0 : index
    %1 = vector.load %arg3[%c0_1, %c0_2] : memref<2x128xf32, #tpu.memory_space<vmem>>, vector<2x128xf32>
    %2 = arith.subf %0, %1 : vector<2x128xf32>
    %cst = arith.constant 9.99999997E-7 : f32
    %3 = vector.broadcast %cst : f32 to vector<2x128xf32>
    %4 = arith.addf %2, %3 : vector<2x128xf32>
    %5 = arith.mulf %4, %4 : vector<2x128xf32>
    %c0_3 = arith.constant 0 : index
    %c0_4 = arith.constant 0 : index
    %6 = vector.load %arg5[%c0_3, %c0_4] : memref<128x4xf32, #tpu.memory_space<vmem>>, vector<128x4xf32>
    %cst_5 = arith.constant dense<0.000000e+00> : vector<2x4xf32>
    %7 = tpu.matmul %5, %6, %cst_5 {dimension_numbers = #tpu.dot_dimension_numbers<[1], [0], [0], [1], [0, 0, 1, 1], [], []>, precision = #tpu.contract_precision<fp32>} : vector<2x128xf32>, vector<128x4xf32>, vector<2x4xf32> -> vector<2x4xf32>
    %8 = math.sqrt %7 : vector<2x4xf32>
    %c0_6 = arith.constant 0 : index
    %c0_7 = arith.constant 0 : index
    %9 = vector.load %arg4[%c0_6, %c0_7] : memref<2x4xf32, #tpu.memory_space<vmem>>, vector<2x4xf32>
    %c0_8 = arith.constant 0 : index
    %10 = memref.load %arg1[%c0_8] : memref<1xf32, #tpu.memory_space<smem>>
    %11 = vector.broadcast %10 : f32 to vector<2x4xf32>
    %12 = arith.subf %11, %8 : vector<2x4xf32>
    %cst_9 = arith.constant 0.000000e+00 : f32
    %13 = vector.broadcast %cst_9 : f32 to vector<2x4xf32>
    %14 = arith.maximumf %12, %13 : vector<2x4xf32>
    %cst_10 = arith.constant 1.000000e+00 : f32
    %15 = vector.broadcast %cst_10 : f32 to vector<2x4xf32>
    %16 = arith.subf %15, %9 : vector<2x4xf32>
    %17 = arith.mulf %16, %7 : vector<2x4xf32>
    %18 = arith.mulf %14, %14 : vector<2x4xf32>
    %19 = arith.mulf %9, %18 : vector<2x4xf32>
    %20 = arith.addf %17, %19 : vector<2x4xf32>
    %21 = vector.shape_cast %20 : vector<2x4xf32> to vector<1x2x4xf32>
    %cst_11 = arith.constant dense<0.000000e+00> : vector<1xf32>
    %22 = vector.multi_reduction <add>, %21, %cst_11 [1, 2] : vector<1x2x4xf32> to vector<1xf32>
    %23 = vector.shape_cast %22 : vector<1xf32> to vector<1x1x1xf32>
    %24 = vector.extract %23[0, 0, 0] : f32 from vector<1x1x1xf32>
    %25 = vector.broadcast %24 : f32 to vector<1x8x128xf32>
    %c0_12 = arith.constant 0 : index
    %c0_13 = arith.constant 0 : index
    %c0_14 = arith.constant 0 : index
    %26 = vector.load %arg6[%c0_12, %c0_13, %c0_14] : memref<1x8x128xf32, #tpu.memory_space<vmem>>, vector<1x8x128xf32>
    tpu.vector_store %arg6[%c0_12, %c0_13, %c0_14], %25 {strides = array<i32>} : memref<1x8x128xf32, #tpu.memory_space<vmem>>, vector<1x8x128xf32>,
    return
  }
  func.func @transform_0(%arg0: i32) -> i32 {
    %c0_i32 = arith.constant 0 : i32
    %c0_i32_0 = arith.constant 0 : i32
    return %c0_i32 : i32
  }
  func.func @transform_1(%arg0: i32) -> (i32, i32) {
    %c0_i32 = arith.constant 0 : i32
    %c0_i32_0 = arith.constant 0 : i32
    return %arg0, %c0_i32 : i32, i32
  }
  func.func @transform_2(%arg0: i32) -> (i32, i32) {
    %c0_i32 = arith.constant 0 : i32
    %c0_i32_0 = arith.constant 0 : i32
    return %arg0, %c0_i32 : i32, i32
  }
  func.func @transform_3(%arg0: i32) -> (i32, i32) {
    %c0_i32 = arith.constant 0 : i32
    %c0_i32_0 = arith.constant 0 : i32
    return %arg0, %c0_i32 : i32, i32
  }
  func.func @transform_4(%arg0: i32) -> (i32, i32) {
    %c0_i32 = arith.constant 0 : i32
    %c0_i32_0 = arith.constant 0 : i32
    %c0_i32_1 = arith.constant 0 : i32
    return %c0_i32, %c0_i32_0 : i32, i32
  }
  func.func @transform_5(%arg0: i32) -> (i32, i32, i32) {
    %c0_i32 = arith.constant 0 : i32
    %c0_i32_0 = arith.constant 0 : i32
    %c0_i32_1 = arith.constant 0 : i32
    return %arg0, %c0_i32, %c0_i32_0 : i32, i32, i32
  }
}

</mosaic_0001>

<bundles_post_ra>
// kernel: tpu_custom_call.1
= control target key start
LH: loop header
LB: loop body
LE: loop exit
PB: predicated region body
PF: predicated region fallthrough
CT: control target
= control target key end

     0   :  { %s798_s0 = inlined_call_operand.<no memory space> [shape: f32[1], index: 0, kind: input, shape index: {}]   ;;  %s799_s1 = inlined_call_operand.vmem [shape: f32[2,128], index: 1, kind: input, shape index: {}]   ;;  %s800_s2 = inlined_call_operand.vmem [shape: f32[2,128], index: 2, kind: input, shape index: {}]   ;;  %s801_s3 = inlined_call_operand.vmem [shape: f32[2,4], index: 3, kind: input, shape index: {}]   ;;  %s802_s4 = inlined_call_operand.vmem [shape: f32[128,4], index: 4, kind: input, shape index: {}]   ;;  %s803_s5 = inlined_call_operand.hbm [shape: f32[1,8,128], index: 5, kind: output, shape index: {}]  }
   0x1   :  { %v42_v0 = vld [vmem:[%s802_s4 + $0x78] sm:$0xff]  ;;  %v41_v1 = vld [vmem:[%s802_s4 + $0x70] sm:$0xff]  ;;  %v40_v2 = vld [vmem:[%s802_s4 + $0x68] sm:$0xff] }
   0x2   :  { %v506_v3 = vand.u32 4294901760, %v42_v0  ;;  %v508_v4 = vand.u32 4294901760, %v41_v1  ;;  %v510_v5 = vand.u32 4294901760, %v40_v2  ;;  %v39_v6 = vld [vmem:[%s802_s4 + $0x60] sm:$0xff]  ;;  %v38_v7 = vld [vmem:[%s802_s4 + $0x58] sm:$0xff]  ;;  %v37_v8 = vld [vmem:[%s802_s4 + $0x50] sm:$0xff] }
   0x3   :  { %v521_v9 = vand.u32 4294901760, %v39_v6  ;;  %v523_v10 = vand.u32 4294901760, %v38_v7  ;;  %v525_v11 = vand.u32 4294901760, %v37_v8  ;;  %v36_v12 = vld [vmem:[%s802_s4 + $0x48] sm:$0xff]  ;;  %v35_v13 = vld [vmem:[%s802_s4 + $0x40] sm:$0xff]  ;;  %v34_v18 = vld [vmem:[%s802_s4 + $0x38] sm:$0xff] }
   0x4   :  { %44 = vmatpush.msra.mxu0 %v506_v3  ;;  %v535_v14 = vsub.f32 %v42_v0, %v506_v3  ;;  %v538_v15 = vsub.f32 %v41_v1, %v508_v4  ;;  %v541_v16 = vsub.f32 %v40_v2, %v510_v5  ;;  %v543_v17 = vand.u32 4294901760, %v36_v12  ;;  %240 = vmatpush.msra.mxu3 %v506_v3  ;;  %v33_v26 = vld [vmem:[%s802_s4 + $0x30] sm:$0xff] }
   0x5   :  { %v550_v19 = vsub.f32 %v39_v6, %v521_v9  ;;  %v553_v20 = vsub.f32 %v38_v7, %v523_v10  ;;  %v556_v21 = vsub.f32 %v37_v8, %v525_v11  ;;  %v562_v25 = vand.u32 4294901760, %v35_v13 }
   0x6   :  { %46 = vmatpush.msra.mxu0 %v508_v4  ;;  %v86_v22 = vand.u32 4294901760, %v535_v14  ;;  %v92_v23 = vand.u32 4294901760, %v538_v15  ;;  %v98_v24 = vand.u32 4294901760, %v541_v16  ;;  %187 = vmatpush.msra.mxu2 %v535_v14  ;;  %v569_v28 = vand.u32 4294901760, %v34_v18 }
   0x7   :  { %v104_v27 = vand.u32 4294901760, %v550_v19  ;;  %v572_v29 = vsub.f32 %v36_v12, %v543_v17  ;;  %242 = vmatpush.msra.mxu3 %v508_v4 }
   0x8   :  { %11 = vsyncpa [#allocation4], 0  ;;  %48 = vmatpush.msra.mxu0 %v510_v5  ;;  %v87_v30 = vsub.f32 %v535_v14, %v86_v22  ;;  %v93_v31 = vsub.f32 %v538_v15, %v92_v23  ;;  %v99_v32 = vsub.f32 %v541_v16, %v98_v24  ;;  %v110_v33 = vand.u32 4294901760, %v553_v20  ;;  %190 = vmatpush.msra.mxu2 %v538_v15  ;;  %v32_v36 = vld [vmem:[%s802_s4 + $0x28] sm:$0xff]  ;;  %v31_v41 = vld [vmem:[%s802_s4 + $0x20] sm:$0xff]  ;;  %s426_s7 = sshll.u32 %s803_s5, 4  ;;  %s427_s7 = int_to_ptr.hbm [resolvable:$true] %s426_s7 }
   0x9   :  { %v116_v34 = vand.u32 4294901760, %v556_v21  ;;  %v588_v35 = vand.u32 4294901760, %v33_v26  ;;  %244 = vmatpush.msra.mxu3 %v510_v5  ;;  %v105_v39 = vsub.f32 %v550_v19, %v104_v27  ;;  %v599_v40 = vsub.f32 %v35_v13, %v562_v25  ;;  %v30_v47 = vld [vmem:[%s802_s4 + $0x18] sm:$0xff]  ;;  %v29_v55 = vld [vmem:[%s802_s4 + $0x10] sm:$0xff]  ;;  %v28_v60 = vld [vmem:[%s802_s4 + $0x8] sm:$0xff] }
   0xa   :  { %v88_v37 = vand.u32 4294901760, %v87_v30  ;;  %50 = vmatpush.msra.mxu0 %v521_v9  ;;  %v94_v38 = vand.u32 4294901760, %v93_v31  ;;  %193 = vmatpush.msra.mxu2 %v541_v16  ;;  %v122_v42 = vand.u32 4294901760, %v572_v29  ;;  %v100_v43 = vand.u32 4294901760, %v99_v32  ;;  %v22_v61 = vld [vmem:[%s799_s1] sm:$0x3] }
   0xb   :  { %246 = vmatpush.msra.mxu3 %v521_v9  ;;  %v111_v44 = vsub.f32 %v553_v20, %v110_v33  ;;  %v611_v45 = vand.u32 4294901760, %v32_v36  ;;  %v614_v46 = vsub.f32 %v34_v18, %v569_v28  ;;  %v619_v48 = vand.u32 4294901760, %v31_v41  ;;  %v23_v62 = vld [vmem:[%s800_s2] sm:$0x3] }
   0xc   :  { %89 = vmatpush.msra.mxu1 %v88_v37  ;;  %52 = vmatpush.msra.mxu0 %v523_v10  ;;  %v106_v49 = vand.u32 4294901760, %v105_v39  ;;  %v117_v50 = vsub.f32 %v556_v21, %v116_v34  ;;  %v128_v51 = vand.u32 4294901760, %v599_v40  ;;  %v629_v52 = vsub.f32 %v33_v26, %v588_v35  ;;  %v27_v6 = vld [vmem:[%s802_s4] sm:$0xff] }
   0xd   :  { %196 = vmatpush.msra.mxu2 %v550_v19  ;;  %248 = vmatpush.msra.mxu3 %v523_v10  ;;  %v123_v53 = vsub.f32 %v572_v29, %v122_v42  ;;  %v634_v54 = vand.u32 4294901760, %v30_v47  ;;  %v112_v56 = vand.u32 4294901760, %v111_v44  ;;  %v134_v57 = vand.u32 4294901760, %v614_v46 }
   0xe   :  { %95 = vmatpush.msra.mxu1 %v94_v38  ;;  %54 = vmatpush.msra.mxu0 %v525_v11  ;;  %v644_v58 = vsub.f32 %v32_v36, %v611_v45  ;;  %v647_v59 = vsub.f32 %v31_v41, %v619_v48  ;;  %v118_v63 = vand.u32 4294901760, %v117_v50  ;;  %v129_v0 = vsub.f32 %v599_v40, %v128_v51 }
   0xf   :  { %199 = vmatpush.msra.mxu2 %v553_v20  ;;  %250 = vmatpush.msra.mxu3 %v525_v11  ;;  %v140_v1 = vand.u32 4294901760, %v629_v52  ;;  %v665_v2 = vand.u32 4294901760, %v29_v55  ;;  %v124_v7 = vand.u32 4294901760, %v123_v53  ;;  %v671_v8 = vsub.f32 %v30_v47, %v634_v54 }
  0x10   :  { %101 = vmatpush.msra.mxu1 %v100_v43  ;;  %56 = vmatpush.msra.mxu0 %v543_v17  ;;  %v135_v12 = vsub.f32 %v614_v46, %v134_v57  ;;  %v146_v13 = vand.u32 4294901760, %v644_v58  ;;  %v680_v18 = vand.u32 4294901760, %v28_v60  ;;  %v24_v26 = vsub.f32 %v22_v61, %v23_v62 }
  0x11   :  { %202 = vmatpush.msra.mxu2 %v556_v21  ;;  %252 = vmatpush.msra.mxu3 %v543_v17  ;;  %v152_v30 = vand.u32 4294901760, %v647_v59  ;;  %v683_v31 = vand.u32 4294901760, %v27_v6  ;;  %v130_v32 = vand.u32 4294901760, %v129_v0  ;;  %v141_v36 = vsub.f32 %v629_v52, %v140_v1 }
  0x12   :  { %107 = vmatpush.msra.mxu1 %v106_v49  ;;  %58 = vmatpush.msra.mxu0 %v562_v25  ;;  %v692_v37 = vsub.f32 %v29_v55, %v665_v2  ;;  %v25_v38 = vadd.f32 1e-06, %v24_v26  ;;  %v158_v39 = vand.u32 4294901760, %v671_v8  ;;  %v136_v41 = vand.u32 4294901760, %v135_v12 }
  0x13   :  { %205 = vmatpush.msra.mxu2 %v572_v29  ;;  %254 = vmatpush.msra.mxu3 %v562_v25  ;;  %v147_v43 = vsub.f32 %v644_v58, %v146_v13  ;;  %v702_v44 = vsub.f32 %v28_v60, %v680_v18  ;;  %v153_v49 = vsub.f32 %v647_v59, %v152_v30  ;;  %v142_v50 = vand.u32 4294901760, %v141_v36 }
  0x14   :  { %113 = vmatpush.msra.mxu1 %v112_v56  ;;  %60 = vmatpush.msra.mxu0 %v569_v28  ;;  %v26_v47 = vmul.f32 %v25_v38, %v25_v38  ;;  %v164_v53 = vand.u32 4294901760, %v692_v37  ;;  %v712_v55 = vsub.f32 %v27_v6, %v683_v31  ;;  %v159_v61 = vsub.f32 %v671_v8, %v158_v39 }
  0x15   :  { %208 = vmatpush.msra.mxu2 %v599_v40  ;;  %256 = vmatpush.msra.mxu3 %v569_v28  ;;  %v148_v60 = vand.u32 4294901760, %v147_v43  ;;  %v170_v62 = vand.u32 4294901760, %v702_v44  ;;  %v154_v0 = vand.u32 4294901760, %v153_v49  ;;  %v398_v29 = vstv %s798_s0  ;;  %s466_s0 = smov [#allocation3]  }
  0x16   :  { %119 = vmatpush.msra.mxu1 %v118_v63  ;;  %62 = vmatpush.msra.mxu0 %v588_v35  ;;  %v714_v56 = vand.u32 4294901760, %v26_v47  ;;  %v165_v6 = vsub.f32 %v692_v37, %v164_v53  ;;  %v160_v26 = vand.u32 4294901760, %v159_v61  ;;  %vm406_vm2 = vcmask 25600  }
  0x17   :  { %211 = vmatpush.msra.mxu2 %v614_v46  ;;  %258 = vmatpush.msra.mxu3 %v588_v35 }
  0x18   :  { %125 = vmatpush.msra.mxu1 %v124_v7  ;;  %64 = vmatpush.msra.mxu0 %v611_v45  ;;  %v76_v63 = vsub.f32 %v26_v47, %v714_v56  ;;  %v176_v7 = vand.u32 4294901760, %v712_v55  ;;  %v166_v38 = vand.u32 4294901760, %v165_v6 }
  0x19   :  { %214 = vmatpush.msra.mxu2 %v629_v52  ;;  %260 = vmatpush.msra.mxu3 %v611_v45 }
  0x1a   :  { %131 = vmatpush.msra.mxu1 %v130_v32  ;;  %66 = vmatpush.msra.mxu0 %v619_v48  ;;  %v77_v12 = vand.u32 4294901760, %v76_v63  ;;  %v171_v32 = vsub.f32 %v702_v44, %v170_v62 }
  0x1b   :  { %217 = vmatpush.msra.mxu2 %v644_v58  ;;  %262 = vmatpush.msra.mxu3 %v619_v48 }
  0x1c   :  { %137 = vmatpush.msra.mxu1 %v136_v41  ;;  %68 = vmatpush.msra.mxu0 %v634_v54  ;;  %v78_v36 = vsub.f32 %v76_v63, %v77_v12  ;;  %v177_v41 = vsub.f32 %v712_v55, %v176_v7  ;;  %v172_v43 = vand.u32 4294901760, %v171_v32 }
  0x1d   :  { %220 = vmatpush.msra.mxu2 %v647_v59  ;;  %264 = vmatpush.msra.mxu3 %v634_v54 }
  0x1e   :  { %143 = vmatpush.msra.mxu1 %v142_v50  ;;  %70 = vmatpush.msra.mxu0 %v665_v2  ;;  %v79_v47 = vand.u32 4294901760, %v78_v36  ;;  %v178_v49 = vand.u32 4294901760, %v177_v41 }
  0x1f   :  { %223 = vmatpush.msra.mxu2 %v671_v8  ;;  %266 = vmatpush.msra.mxu3 %v665_v2 }
  0x20   :  { %149 = vmatpush.msra.mxu1 %v148_v60  ;;  %72 = vmatpush.msra.mxu0 %v680_v18 }
  0x21   :  { %226 = vmatpush.msra.mxu2 %v692_v37  ;;  %268 = vmatpush.msra.mxu3 %v680_v18 }
  0x22   :  { %155 = vmatpush.msra.mxu1 %v154_v0  ;;  %74 = vmatpush.msra.mxu0 %v683_v31 }
  0x23   :  { %229 = vmatpush.msra.mxu2 %v702_v44  ;;  %270 = vmatpush.msra.mxu3 %v683_v31 }
  0x24   :  { %281 = vmatpush.msrb.mxu0 %v86_v22  ;;  %161 = vmatpush.msra.mxu1 %v160_v26 }
  0x25   :  { %232 = vmatpush.msra.mxu2 %v712_v55  ;;  %274 = vmatmul.f32.vlgmr.msra.gmra.mxu3 %v77_v12 }
  0x26   :  { %285 = vmatpush.msrb.mxu0 %v92_v23  ;;  %167 = vmatpush.msra.mxu1 %v166_v38 }
  0x27   :  { %235 = vmatmul.f32.vlgmr.msra.gmra.mxu2 %v76_v63  ;;  %80 = vmatmul.f32.vlgmr.msra.gmra.mxu0 %v79_v47 }
  0x28   :  { %289 = vmatpush.msrb.mxu0 %v98_v24  ;;  %173 = vmatpush.msra.mxu1 %v172_v43 }
  0x2a   :  { %293 = vmatpush.msrb.mxu0 %v104_v27  ;;  %179 = vmatpush.msra.mxu1 %v178_v49 }
  0x2b   :  { %181 = vmatmul.f32.vlgmr.msra.gmra.mxu1 %v714_v56 }
  0x2c   :  { %348 = vmatpush.msrb.mxu1 %v506_v3  ;;  %297 = vmatpush.msrb.mxu0 %v110_v33 }
  0x2e   :  { %350 = vmatpush.msrb.mxu1 %v508_v4  ;;  %301 = vmatpush.msrb.mxu0 %v116_v34 }
  0x30   :  { %352 = vmatpush.msrb.mxu1 %v510_v5  ;;  %305 = vmatpush.msrb.mxu0 %v122_v42 }
  0x32   :  { %354 = vmatpush.msrb.mxu1 %v521_v9  ;;  %309 = vmatpush.msrb.mxu0 %v128_v51 }
  0x34   :  { %356 = vmatpush.msrb.mxu1 %v523_v10  ;;  %313 = vmatpush.msrb.mxu0 %v134_v57 }
  0x36   :  { %358 = vmatpush.msrb.mxu1 %v525_v11  ;;  %317 = vmatpush.msrb.mxu0 %v140_v1 }
  0x38   :  { %360 = vmatpush.msrb.mxu1 %v543_v17  ;;  %321 = vmatpush.msrb.mxu0 %v146_v13 }
  0x3a   :  { %362 = vmatpush.msrb.mxu1 %v562_v25  ;;  %325 = vmatpush.msrb.mxu0 %v152_v30 }
  0x3c   :  { %364 = vmatpush.msrb.mxu1 %v569_v28  ;;  %329 = vmatpush.msrb.mxu0 %v158_v39 }
  0x3e   :  { %366 = vmatpush.msrb.mxu1 %v588_v35  ;;  %333 = vmatpush.msrb.mxu0 %v164_v53  ;;  %v396_v35 = vld [vmem:[%s801_s3] sm:$0x3]  ;;  %s424_s3 = sshll.u32 %s466_s0, 4  ;;  %s425_s3 = int_to_ptr.vmem [resolvable:$true] %s424_s3 }
  0x40   :  { %368 = vmatpush.msrb.mxu1 %v611_v45  ;;  %337 = vmatpush.msrb.mxu0 %v170_v62  ;;  %v401_v45 = vsub.f32 1.0, %v396_v35 }
  0x42   :  { %370 = vmatpush.msrb.mxu1 %v619_v48  ;;  %341 = vmatpush.msrb.mxu0 %v176_v7 }
  0x43   :  { %343 = vmatmul.f32.vlgmr.msrb.gmra.mxu0 %v714_v56 }
  0x44   :  { %372 = vmatpush.msrb.mxu1 %v634_v54 }
  0x46   :  { %374 = vmatpush.msrb.mxu1 %v665_v2 }
  0x48   :  { %376 = vmatpush.msrb.mxu1 %v680_v18 }
  0x4a   :  { %378 = vmatpush.msrb.mxu1 %v683_v31 }
  0x4b   :  { %380 = vmatmul.f32.vlgmr.msrb.gmra.mxu1 %v714_v56 }
  0xa4   :  { %v81_v4 = vpop.f32.mrf.mxu0 }
  0xa8   :  { %v182_v3 = vpop.f32.mrf.mxu1  ;;  %v275_v11 = vpop.f32.mrf.mxu3 }
  0xa9   :  { %v183_v5 = vadd.f32 %v182_v3, %v81_v4 }
  0xaa   :  { %v236_v9 = vpop.f32.mrf.mxu2 }
  0xab   :  { %v237_v10 = vadd.f32 %v236_v9, %v183_v5 }
  0xad   :  { %v276_v14 = vadd.f32 %v275_v11, %v237_v10 }
  0xc0   :  { %v344_v15 = vpop.f32.mrf.mxu0 }
  0xc1   :  { %v345_v16 = vadd.f32 %v344_v15, %v276_v14 }
  0xc8   :  { %v381_v17 = vpop.f32.mrf.mxu1 }
  0xc9   :  { %v382_v19 = vadd.f32 %v381_v17, %v345_v16 }
  0xcb   :  { %438 = vrsqrt.f32 %v382_v19  ;;  %vm391_vm0 = vcmp.eq.f32.partialorder %v382_v19, inf  ;;  %v394_v28 = vand.u32 2147483648, %v382_v19  ;;  %vm393_vm1 = vcmp.eq.f32.partialorder %v382_v19, 0.0 }
  0xcc   :  { %v402_v48 = vmul.f32 %v401_v45, %v382_v19 }
  0xd1   :  { %v439_v20 = vpop.eup %438 }
  0xd2   :  { %v385_v21 = vmul.f32 %v439_v20, %v382_v19 }
  0xd4   :  { %v386_v22 = vmul.f32 %v439_v20, %v385_v21 }
  0xd6   :  { %v387_v23 = vmul.f32 0.5, %v386_v22 }
  0xd8   :  { %v388_v24 = vsub.f32 1.5, %v387_v23 }
  0xda   :  { %v389_v25 = vmul.f32 %v439_v20, %v388_v24 }
  0xdc   :  { %v390_v27 = vmul.f32 %v389_v25, %v382_v19 }
  0xde   :  { %v392_v33 = vsel %vm391_vm0, %v382_v19, %v390_v27 }
  0xdf   :  { %v395_v34 = vsel %vm393_vm1, %v394_v28, %v392_v33 }
  0xe0   :  { %v399_v40 = vsub.f32 %v398_v29, %v395_v34 }
  0xe2   :  { %v400_v42 = vmax.f32 %v399_v40, 0.0 }
  0xe4   :  { %v403_v46 = vmul.f32 %v400_v42, %v400_v42 }
  0xe6   :  { %v404_v51 = vmul.f32 %v403_v46, %v396_v35 }
  0xe8   :  { %v405_v52 = vadd.f32 %v404_v51, %v402_v48 }
  0xea   :  { %v407_v54 = vsel %vm406_vm2, %v405_v52, 0.0 }
  0xeb   :  { %408 = vadd.xlane.f32.xlu0 %v407_v54 }
 0x15e   :  { %v409_v57 = vpop.xlane.xlu0 %408 }
 0x15f   :  { %v410_v58 = vrot.slane %v409_v57, 4 }
 0x161   :  { %v411_v59 = vadd.f32 %v410_v58, %v409_v57 }
 0x163   :  { %v412_v1 = vrot.slane %v411_v59, 2 }
 0x165   :  { %v413_v2 = vadd.f32 %v412_v1, %v411_v59 }
 0x167   :  { %v414_v8 = vrot.slane %v413_v2, 1 }
 0x169   :  { %v415_v13 = vadd.f32 %v414_v8, %v413_v2 }
 0x16b   :  { %435 = vpush %v415_v13 }
 0x19c   :  { %s436_s8 = spop %435 }
 0x19d   :  { %v417_v18 = vstv %s436_s8 }
 0x19e   :  { %418 = vst [vmem:[#allocation3] sm:$0xff] %v417_v18 }
 0x19f   :  { %429 = dma.vmem_to_hbm [thread:$0]  %s425_s3, 128, %s427_s7, [#allocation4]  }
 0x1a0   :  { %464 = dma.done.wait [#allocation4], 128  }
 0x1a1   :  { %465 = vsyncadd [#allocation4], 4294967168 }
 0x1a2   :  { %434 = vsyncpa [#allocation4], 1 }

</bundles_post_ra>
